<compile_context>
chip_gen: v5e
topology: v5e:2x2
jax: 0.10.0
libtpu: 0.0.40
codegen_flags: <defaults>
</compile_context>

<pallas_src>
import math

import jax
import jax.numpy as jnp
from jax.experimental import pallas as pl
from jax.experimental.pallas import tpu as pltpu

LANE = 128


def _round_up(n, m):
    return ((n + m - 1) // m) * m


def npcai_kernel(x_ref, w1_ref, b1_ref, w2_ref, b2_ref, w3_ref, b3_ref, o_ref):
    # fc1: x arrives at its true (unpadded) feature width; cast to bf16 for the MXU,
    # accumulate in f32.  ReLU / softmax epilogue stays f32 (v5e has no bf16 VPU/EUP).
    x = x_ref[...].astype(jnp.bfloat16)                                   # (tm, input_size)
    h1 = jnp.dot(x, w1_ref[...], preferred_element_type=jnp.float32) + b1_ref[...]
    h1 = jnp.maximum(h1, 0.0)                                             # (tm, hid_p) f32

    h2 = jnp.dot(h1.astype(jnp.bfloat16), w2_ref[...],
                 preferred_element_type=jnp.float32) + b2_ref[...]
    h2 = jnp.maximum(h2, 0.0)

    # fc3 + softmax.  b3's padded lanes are -1e30 and w3's padded columns are zero, so the
    # padded logits come out of the bias add already masked; exp() turns them into exact 0s.
    logits = jnp.dot(h2.astype(jnp.bfloat16), w3_ref[...],
                     preferred_element_type=jnp.float32) + b3_ref[...]
    m = jnp.max(logits, axis=-1, keepdims=True)
    e = jnp.exp(logits - m)
    denom = jnp.sum(e, axis=-1, keepdims=True)
    o_ref[...] = (e * pl.reciprocal(denom, approx=True)).astype(o_ref.dtype)


def npcai_init(key, input_size, hidden_size, output_size):
    """nn.Linear-style U(-1/sqrt(fan_in), 1/sqrt(fan_in)) init.

    Weights are stored (in_features, out_features) so the kernel computes x @ W + b.
    Hidden/output feature dims are zero-padded to 128-lane multiples; fc1 keeps its true
    row count so x needs no lane padding.  Weights are pre-cast to bf16 (MXU operands);
    biases stay f32 (epilogue add).  b3's padded lanes carry the softmax mask (-1e30).
    """
    def linear(k, fan_in, fan_out):
        kw, kb = jax.random.split(k)
        bound = 1.0 / math.sqrt(fan_in)
        w = jax.random.uniform(kw, (fan_in, fan_out), jnp.float32, -bound, bound)
        b = jax.random.uniform(kb, (fan_out,), jnp.float32, -bound, bound)
        return w, b

    k1, k2, k3 = jax.random.split(key, 3)
    w1, b1 = linear(k1, input_size, hidden_size)
    w2, b2 = linear(k2, hidden_size, hidden_size)
    w3, b3 = linear(k3, hidden_size, output_size)

    hid_p = _round_up(hidden_size, LANE)
    out_p = _round_up(output_size, LANE)

    def pad_w(w, rows, cols):
        return jnp.zeros((rows, cols), jnp.float32).at[: w.shape[0], : w.shape[1]].set(w)

    def pad_b(b, cols, pad_value=0.0):
        return jnp.full((1, cols), pad_value, jnp.float32).at[0, : b.shape[0]].set(b)

    return dict(
        w1=pad_w(w1, input_size, hid_p).astype(jnp.bfloat16),   # true rows, padded cols
        b1=pad_b(b1, hid_p),
        w2=pad_w(w2, hid_p, hid_p).astype(jnp.bfloat16),
        b2=pad_b(b2, hid_p),
        w3=pad_w(w3, hid_p, out_p).astype(jnp.bfloat16),
        b3=pad_b(b3, out_p, pad_value=-1e30),                   # mask baked into the bias
        dims=(input_size, hidden_size, output_size, hid_p, out_p),
    )


def _choose_tm(batch, block_rows):
    # tm: multiple of 16 (bf16 vreg is (16,128)), at least 16, at most block_rows.
    tm = min(block_rows, _round_up(max(batch, 1), 16))
    tm = max(16, _round_up(tm, 16))
    # For larger batches keep >= 4 row tiles so the "parallel" grid axis can be sharded
    # across both v7x TensorCores (and per-step overhead still amortizes).
    if batch >= 4 * 16:
        tm = min(tm, max(16, _round_up(pl.cdiv(batch, 4), 16)))
    return tm


def npcai_forward(x, params, *, block_rows=1024, out_dtype=jnp.bfloat16, return_padded=False):
    input_size, hidden_size, output_size, hid_p, out_p = params["dims"]
    B = x.shape[0]
    assert x.shape[1] == input_size

    tm = _choose_tm(B, block_rows)
    b_p = _round_up(B, tm)
    if b_p != B:
        # Row-pad only (no lane pad, no dtype conversion pass over HBM).
        x = jnp.pad(x, ((0, b_p - B), (0, 0)))

    resident = lambda i: (0, 0)                 # constant block -> stays VMEM-resident
    single = pl.Buffered(buffer_count=1)        # one VMEM copy is enough for resident operands

    out_padded = pl.pallas_call(
        npcai_kernel,
        out_shape=jax.ShapeDtypeStruct((b_p, out_p), out_dtype),
        grid=(b_p // tm,),
        in_specs=[
            pl.BlockSpec((tm, input_size), lambda i: (i, 0)),                     # x (row-tiled)
            pl.BlockSpec((input_size, hid_p), resident, pipeline_mode=single),    # w1
            pl.BlockSpec((1, hid_p), resident, pipeline_mode=single),             # b1
            pl.BlockSpec((hid_p, hid_p), resident, pipeline_mode=single),         # w2
            pl.BlockSpec((1, hid_p), resident, pipeline_mode=single),             # b2
            pl.BlockSpec((hid_p, out_p), resident, pipeline_mode=single),         # w3
            pl.BlockSpec((1, out_p), resident, pipeline_mode=single),             # b3
        ],
        out_specs=pl.BlockSpec((tm, out_p), lambda i: (i, 0)),   # lane-dense 128-wide store
        compiler_params=pltpu.CompilerParams(
            dimension_semantics=("parallel",),   # v7x: shard row tiles across both TCs
        ),
    )(x, params["w1"], params["b1"], params["w2"], params["b2"],
      params["w3"], params["b3"])

    if return_padded:
        # (b_p, out_p): padded lanes are exact zeros, padded rows are dummies.
        return out_padded
    return out_padded[:B, :output_size]


if __name__ == "__main__":
    # Small shapes consistent with the module: NPCAI(input_size, hidden_size, output_size)
    batch = 2
    input_size = 16
    hidden_size = 32
    output_size = 8

    key = jax.random.PRNGKey(0)
    kx, kp = jax.random.split(key)

    x = jax.random.normal(kx, (batch, input_size), jnp.float32)
    params = npcai_init(kp, input_size, hidden_size, output_size)

    out = npcai_forward(x, params)
    out = jax.block_until_ready(out)

    # Reference: identical forward in plain JAX with the same bf16-quantized operands and
    # f32 accumulation (matches the MXU bf16-multiply / f32-accumulate path).
    w1 = params["w1"][:input_size, :hidden_size].astype(jnp.float32)
    b1 = params["b1"][:, :hidden_size]
    w2 = params["w2"][:hidden_size, :hidden_size].astype(jnp.float32)
    b2 = params["b2"][:, :hidden_size]
    w3 = params["w3"][:hidden_size, :output_size].astype(jnp.float32)
    b3 = params["b3"][:, :output_size]
    x_q = x.astype(jnp.bfloat16).astype(jnp.float32)
    h1 = jnp.maximum(x_q @ w1 + b1, 0.0)
    h2 = jnp.maximum(h1.astype(jnp.bfloat16).astype(jnp.float32) @ w2 + b2, 0.0)
    ref = jax.nn.softmax(h2.astype(jnp.bfloat16).astype(jnp.float32) @ w3 + b3, axis=1)

    out_f32 = out.astype(jnp.float32)
    assert out.shape == (batch, output_size)
    assert out.dtype == jnp.bfloat16
    assert bool(jnp.all(jnp.isfinite(out_f32)))
    # bf16 store + approx reciprocal: rows sum to 1 within bf16/EUP tolerance.
    assert jnp.allclose(jnp.sum(out_f32, axis=1), 1.0, atol=3e-2)
    assert jnp.allclose(out_f32, ref, atol=2e-2, rtol=2e-2)

    print("KERNEL_OK")
</pallas_src>

<mosaic_0001>
module attributes {stable_mosaic.version = 11 : i64} {
  func.func @npcai_kernel(%arg0: i32, %arg1: memref<16x16xf32, #tpu.memory_space<vmem>>, %arg2: memref<16x128xbf16, #tpu.memory_space<vmem>>, %arg3: memref<1x128xf32, #tpu.memory_space<vmem>>, %arg4: memref<128x128xbf16, #tpu.memory_space<vmem>>, %arg5: memref<1x128xf32, #tpu.memory_space<vmem>>, %arg6: memref<128x128xbf16, #tpu.memory_space<vmem>>, %arg7: memref<1x128xf32, #tpu.memory_space<vmem>>, %arg8: memref<16x128xbf16, #tpu.memory_space<vmem>>) attributes {dimension_semantics = [#tpu.dimension_semantics<parallel>], iteration_bounds = array<i64: 1>, scalar_prefetch = 0 : i64, scratch_operands = 0 : i64, tpu.core_type = #tpu.core_type<tc>, window_params = [{transform_indices = @transform_0, window_bounds = array<i64: 16, 16>}, {pipeline_mode = #tpu.pipeline_mode<synchronous>, transform_indices = @transform_1, window_bounds = array<i64: 16, 128>}, {pipeline_mode = #tpu.pipeline_mode<synchronous>, transform_indices = @transform_2, window_bounds = array<i64: 1, 128>}, {pipeline_mode = #tpu.pipeline_mode<synchronous>, transform_indices = @transform_3, window_bounds = array<i64: 128, 128>}, {pipeline_mode = #tpu.pipeline_mode<synchronous>, transform_indices = @transform_4, window_bounds = array<i64: 1, 128>}, {pipeline_mode = #tpu.pipeline_mode<synchronous>, transform_indices = @transform_5, window_bounds = array<i64: 128, 128>}, {pipeline_mode = #tpu.pipeline_mode<synchronous>, transform_indices = @transform_6, window_bounds = array<i64: 1, 128>}, {transform_indices = @transform_7, window_bounds = array<i64: 16, 128>}]} {
    %c0 = arith.constant 0 : index
    %c0_0 = arith.constant 0 : index
    %0 = vector.load %arg1[%c0, %c0_0] : memref<16x16xf32, #tpu.memory_space<vmem>>, vector<16x16xf32>
    %1 = arith.truncf %0 : vector<16x16xf32> to vector<16x16xbf16>
    %c0_1 = arith.constant 0 : index
    %c0_2 = arith.constant 0 : index
    %2 = vector.load %arg2[%c0_1, %c0_2] : memref<16x128xbf16, #tpu.memory_space<vmem>>, vector<16x128xbf16>
    %cst = arith.constant dense<0.000000e+00> : vector<16x128xf32>
    %3 = tpu.matmul %1, %2, %cst {dimension_numbers = #tpu.dot_dimension_numbers<[1], [0], [0], [1], [0, 0, 1, 1], [], []>} : vector<16x16xbf16>, vector<16x128xbf16>, vector<16x128xf32> -> vector<16x128xf32>
    %c0_3 = arith.constant 0 : index
    %c0_4 = arith.constant 0 : index
    %4 = vector.load %arg3[%c0_3, %c0_4] : memref<1x128xf32, #tpu.memory_space<vmem>>, vector<1x128xf32>
    %5 = vector.broadcast %4 : vector<1x128xf32> to vector<16x128xf32>
    %6 = arith.addf %3, %5 : vector<16x128xf32>
    %cst_5 = arith.constant 0.000000e+00 : f32
    %7 = vector.broadcast %cst_5 : f32 to vector<16x128xf32>
    %8 = arith.maximumf %6, %7 : vector<16x128xf32>
    %9 = arith.truncf %8 : vector<16x128xf32> to vector<16x128xbf16>
    %c0_6 = arith.constant 0 : index
    %c0_7 = arith.constant 0 : index
    %10 = vector.load %arg4[%c0_6, %c0_7] : memref<128x128xbf16, #tpu.memory_space<vmem>>, vector<128x128xbf16>
    %cst_8 = arith.constant dense<0.000000e+00> : vector<16x128xf32>
    %11 = tpu.matmul %9, %10, %cst_8 {dimension_numbers = #tpu.dot_dimension_numbers<[1], [0], [0], [1], [0, 0, 1, 1], [], []>} : vector<16x128xbf16>, vector<128x128xbf16>, vector<16x128xf32> -> vector<16x128xf32>
    %c0_9 = arith.constant 0 : index
    %c0_10 = arith.constant 0 : index
    %12 = vector.load %arg5[%c0_9, %c0_10] : memref<1x128xf32, #tpu.memory_space<vmem>>, vector<1x128xf32>
    %13 = vector.broadcast %12 : vector<1x128xf32> to vector<16x128xf32>
    %14 = arith.addf %11, %13 : vector<16x128xf32>
    %cst_11 = arith.constant 0.000000e+00 : f32
    %15 = vector.broadcast %cst_11 : f32 to vector<16x128xf32>
    %16 = arith.maximumf %14, %15 : vector<16x128xf32>
    %17 = arith.truncf %16 : vector<16x128xf32> to vector<16x128xbf16>
    %c0_12 = arith.constant 0 : index
    %c0_13 = arith.constant 0 : index
    %18 = vector.load %arg6[%c0_12, %c0_13] : memref<128x128xbf16, #tpu.memory_space<vmem>>, vector<128x128xbf16>
    %cst_14 = arith.constant dense<0.000000e+00> : vector<16x128xf32>
    %19 = tpu.matmul %17, %18, %cst_14 {dimension_numbers = #tpu.dot_dimension_numbers<[1], [0], [0], [1], [0, 0, 1, 1], [], []>} : vector<16x128xbf16>, vector<128x128xbf16>, vector<16x128xf32> -> vector<16x128xf32>
    %c0_15 = arith.constant 0 : index
    %c0_16 = arith.constant 0 : index
    %20 = vector.load %arg7[%c0_15, %c0_16] : memref<1x128xf32, #tpu.memory_space<vmem>>, vector<1x128xf32>
    %21 = vector.broadcast %20 : vector<1x128xf32> to vector<16x128xf32>
    %22 = arith.addf %19, %21 : vector<16x128xf32>
    %cst_17 = arith.constant dense<0xFF800000> : vector<16xf32>
    %23 = vector.multi_reduction <maximumf>, %22, %cst_17 [1] : vector<16x128xf32> to vector<16xf32>
    %24 = vector.shape_cast %23 : vector<16xf32> to vector<16x1xf32>
    %25 = vector.broadcast %24 : vector<16x1xf32> to vector<16x128xf32>
    %26 = arith.subf %22, %25 : vector<16x128xf32>
    %27 = math.exp %26 : vector<16x128xf32>
    %cst_18 = arith.constant dense<0.000000e+00> : vector<16xf32>
    %28 = vector.multi_reduction <add>, %27, %cst_18 [1] : vector<16x128xf32> to vector<16xf32>
    %29 = vector.shape_cast %28 : vector<16xf32> to vector<16x1xf32>
    %30 = tpu.reciprocal %29 {approx = true} : vector<16x1xf32> -> vector<16x1xf32>
    %31 = vector.broadcast %30 : vector<16x1xf32> to vector<16x128xf32>
    %32 = arith.mulf %27, %31 : vector<16x128xf32>
    %33 = arith.truncf %32 : vector<16x128xf32> to vector<16x128xbf16>
    %c0_19 = arith.constant 0 : index
    %c0_20 = arith.constant 0 : index
    %34 = vector.load %arg8[%c0_19, %c0_20] : memref<16x128xbf16, #tpu.memory_space<vmem>>, vector<16x128xbf16>
    tpu.vector_store %arg8[%c0_19, %c0_20], %33 {strides = array<i32>} : memref<16x128xbf16, #tpu.memory_space<vmem>>, vector<16x128xbf16>,
    return
  }
  func.func @transform_0(%arg0: i32) -> (i32, i32) {
    %c0_i32 = arith.constant 0 : i32
    %c0_i32_0 = arith.constant 0 : i32
    return %arg0, %c0_i32 : i32, i32
  }
  func.func @transform_1(%arg0: i32) -> (i32, i32) {
    %c0_i32 = arith.constant 0 : i32
    %c0_i32_0 = arith.constant 0 : i32
    %c0_i32_1 = arith.constant 0 : i32
    return %c0_i32, %c0_i32_0 : i32, i32
  }
  func.func @transform_2(%arg0: i32) -> (i32, i32) {
    %c0_i32 = arith.constant 0 : i32
    %c0_i32_0 = arith.constant 0 : i32
    %c0_i32_1 = arith.constant 0 : i32
    return %c0_i32, %c0_i32_0 : i32, i32
  }
  func.func @transform_3(%arg0: i32) -> (i32, i32) {
    %c0_i32 = arith.constant 0 : i32
    %c0_i32_0 = arith.constant 0 : i32
    %c0_i32_1 = arith.constant 0 : i32
    return %c0_i32, %c0_i32_0 : i32, i32
  }
  func.func @transform_4(%arg0: i32) -> (i32, i32) {
    %c0_i32 = arith.constant 0 : i32
    %c0_i32_0 = arith.constant 0 : i32
    %c0_i32_1 = arith.constant 0 : i32
    return %c0_i32, %c0_i32_0 : i32, i32
  }
  func.func @transform_5(%arg0: i32) -> (i32, i32) {
    %c0_i32 = arith.constant 0 : i32
    %c0_i32_0 = arith.constant 0 : i32
    %c0_i32_1 = arith.constant 0 : i32
    return %c0_i32, %c0_i32_0 : i32, i32
  }
  func.func @transform_6(%arg0: i32) -> (i32, i32) {
    %c0_i32 = arith.constant 0 : i32
    %c0_i32_0 = arith.constant 0 : i32
    %c0_i32_1 = arith.constant 0 : i32
    return %c0_i32, %c0_i32_0 : i32, i32
  }
  func.func @transform_7(%arg0: i32) -> (i32, i32) {
    %c0_i32 = arith.constant 0 : i32
    %c0_i32_0 = arith.constant 0 : i32
    return %arg0, %c0_i32 : i32, i32
  }
}

</mosaic_0001>

<bundles_post_ra>
// kernel: tpu_custom_call.1
= control target key start
LH: loop header
LB: loop body
LE: loop exit
PB: predicated region body
PF: predicated region fallthrough
CT: control target
= control target key end

     0   :  { %12 = vsyncpa [#allocation3], 0  ;;  %s661_s0 = inlined_call_operand.hbm [shape: f32[16,16], index: 0, kind: input, shape index: {}]   ;;  %s662_s1 = inlined_call_operand.hbm [shape: bf16[16,128], index: 1, kind: input, shape index: {}]   ;;  %s663_s2 = inlined_call_operand.vmem [shape: f32[1,128], index: 2, kind: input, shape index: {}]   ;;  %s664_s3 = inlined_call_operand.hbm [shape: bf16[128,128], index: 3, kind: input, shape index: {}]   ;;  %s665_s4 = inlined_call_operand.vmem [shape: f32[1,128], index: 4, kind: input, shape index: {}]   ;;  %s666_s5 = inlined_call_operand.hbm [shape: bf16[128,128], index: 5, kind: input, shape index: {}]   ;;  %s667_s6 = inlined_call_operand.vmem [shape: f32[1,128], index: 6, kind: input, shape index: {}]   ;;  %s668_s7 = inlined_call_operand.hbm [shape: bf16[16,128], index: 7, kind: output, shape index: {}]  }
   0x1   :  { %13 = vsyncpa [#allocation6], 0 }
   0x2   :  { %14 = vsyncpa [#allocation9], 0  ;;  %s33_s26 = sshll.u32 %s662_s1, 4  ;;  %s34_s26 = int_to_ptr.hbm [resolvable:$true] %s33_s26 }
   0x3   :  { %15 = vsyncpa [#allocation4], 0  ;;  %s576_s27 = smov [#allocation5]   ;;  %s20_s8 = sshll.u32 %s661_s0, 4  ;;  %s21_s8 = int_to_ptr.hbm [resolvable:$true] %s20_s8 }
   0x4   :  { %s35_s28 = sshll.u32 %s576_s27, 4  ;;  %s577_s9 = smov 64   ;;  %s36_s28 = int_to_ptr.vmem [resolvable:$true] %s35_s28 }
   0x5   :  { %s578_s10 = smov 4   ;;  %s579_s11 = smov [#allocation2]  }
   0x6   :  { %41 = dma.hbm_to_vmem [thread:$0]  %s34_s26, 128, %s36_s28, [#allocation6], %s577_s9, %s577_s9, %s578_s10  }
   0x7   :  { %s22_s12 = sshll.u32 %s579_s11, 4  ;;  %s580_s1 = smov 128   ;;  %s23_s12 = int_to_ptr.vmem [resolvable:$true] %s22_s12 }
   0x8   :  { %s581_s13 = smov 8   ;;  %s48_s16 = sshll.u32 %s664_s3, 4  ;;  %s49_s16 = int_to_ptr.hbm [resolvable:$true] %s48_s16 }
   0x9   :  { %28 = dma.hbm_to_vmem [thread:$0]  %s21_s8, 256, %s23_s12, [#allocation3], %s580_s1, %s580_s1, %s581_s13  }
   0xa   :  { %s582_s17 = smov [#allocation7]   ;;  %s63_s20 = sshll.u32 %s666_s5, 4  ;;  %s64_s20 = int_to_ptr.hbm [resolvable:$true] %s63_s20 }
   0xb   :  { %s50_s0 = sshll.u32 %s582_s17, 4  ;;  %s583_s21 = smov [#allocation8]   ;;  %s51_s0 = int_to_ptr.vmem [resolvable:$true] %s50_s0 }
   0xc   :  { %56 = dma.hbm_to_vmem [thread:$0]  %s49_s16, 1024, %s51_s0, [#allocation6], %s577_s9, %s577_s9, %s578_s10  }
   0xd   :  { %s65_s22 = sshll.u32 %s583_s21, 4  ;;  %s66_s22 = int_to_ptr.vmem [resolvable:$true] %s65_s22 }
   0xe   :  { %71 = dma.hbm_to_vmem [thread:$0]  %s64_s20, 1024, %s66_s22, [#allocation9], %s577_s9, %s577_s9, %s578_s10  }
   0xf   :  { %568 = dma.done.wait [#allocation3], 256  }
  0x10   :  { %569 = vsyncadd [#allocation3], 4294967040 }
  0x11   :  { %570 = dma.done.wait [#allocation6], 1152  }
  0x12   :  { %571 = vsyncadd [#allocation6], 4294966144 }
  0x13   :  { %572 = dma.done.wait [#allocation9], 1024  }
  0x14   :  { %573 = vsyncadd [#allocation9], 4294966272  ;;  %v406_v0 = vld [vmem:[#allocation5] sm:$0xff]  ;;  %v91_v1 = vld [vmem:[#allocation2] sm:$0xff]  ;;  %vm106_vm0 = vcmask 130048   ;;  %s322_s28 = sshll.u32 %s668_s7, 4  ;;  %s323_s28 = int_to_ptr.hbm [resolvable:$true] %s322_s28 }
  0x15   :  { %v92_v2 = vld [vmem:[#allocation2 + $0x8] sm:$0xff]  ;;  %v414_v4 = vld [vmem:[#allocation7 + $0x38] sm:$0xff]  ;;  %117 = vmatpush.bf16.msra.mxu0 %v406_v0  ;;  %v412_v6 = vld [vmem:[#allocation7 + $0x28] sm:$0xff] }
  0x16   :  { %v93_v3 = vpack.c.bf16 %v92_v2, %v91_v1  ;;  %195 = vmatpush.bf16.msra.mxu1 %v414_v4  ;;  %v413_v5 = vld [vmem:[#allocation7 + $0x30] sm:$0xff]  ;;  %v411_v7 = vld [vmem:[#allocation7 + $0x20] sm:$0xff]  ;;  %v410_v8 = vld [vmem:[#allocation7 + $0x18] sm:$0xff] }
  0x17   :  { %v409_v9 = vld [vmem:[#allocation7 + $0x10] sm:$0xff]  ;;  %v408_v10 = vld [vmem:[#allocation7 + $0x8] sm:$0xff]  ;;  %v407_v11 = vld [vmem:[#allocation7] sm:$0xff] }
  0x18   :  { %341 = vmatmul.msk.bf16.vlgmr.msra.gmra.mxu0 %vm106_vm0, %v93_v3  ;;  %v422_v12 = vld [vmem:[#allocation8 + $0x38] sm:$0xff]  ;;  %v421_v13 = vld [vmem:[#allocation8 + $0x30] sm:$0xff]  ;;  %v420_v14 = vld [vmem:[#allocation8 + $0x28] sm:$0xff] }
  0x19   :  { %280 = vmatpush.bf16.msra.mxu2 %v422_v12  ;;  %v419_v15 = vld [vmem:[#allocation8 + $0x20] sm:$0xff]  ;;  %v437_v17 = vld [vmem:[%s663_s2] ss:$0 sm:$0xff]  ;;  %v418_v24 = vld [vmem:[#allocation8 + $0x18] sm:$0xff] }
  0x1a   :  { %196 = vmatpush.bf16.msra.mxu1 %v413_v5  ;;  %v417_v25 = vld [vmem:[#allocation8 + $0x10] sm:$0xff]  ;;  %v416_v26 = vld [vmem:[#allocation8 + $0x8] sm:$0xff]  ;;  %v415_v27 = vld [vmem:[#allocation8] sm:$0xff] }
  0x1b   :  { %v438_v29 = vld [vmem:[%s665_s4] ss:$0 sm:$0xff]  ;;  %s584_s4 = smov [#allocation10]  }
  0x1c   :  { %v439_v36 = vld [vmem:[%s667_s6] ss:$0 sm:$0xff]  ;;  %s320_s6 = sshll.u32 %s584_s4, 4  ;;  %s321_s6 = int_to_ptr.vmem [resolvable:$true] %s320_s6 }
  0x1d   :  { %281 = vmatpush.bf16.msra.mxu2 %v421_v13 }
  0x1e   :  { %197 = vmatpush.bf16.msra.mxu1 %v412_v6 }
  0x21   :  { %282 = vmatpush.bf16.msra.mxu2 %v420_v14 }
  0x22   :  { %198 = vmatpush.bf16.msra.mxu1 %v411_v7 }
  0x25   :  { %283 = vmatpush.bf16.msra.mxu2 %v419_v15 }
  0x26   :  { %199 = vmatpush.bf16.msra.mxu1 %v410_v8 }
  0x29   :  { %284 = vmatpush.bf16.msra.mxu2 %v418_v24 }
  0x2a   :  { %200 = vmatpush.bf16.msra.mxu1 %v409_v9 }
  0x2d   :  { %285 = vmatpush.bf16.msra.mxu2 %v417_v25 }
  0x2e   :  { %201 = vmatpush.bf16.msra.mxu1 %v408_v10 }
  0x31   :  { %286 = vmatpush.bf16.msra.mxu2 %v416_v26 }
  0x32   :  { %202 = vmatpush.bf16.msra.mxu1 %v407_v11 }
  0x35   :  { %287 = vmatpush.bf16.msra.mxu2 %v415_v27 }
  0x95   :  { %v119_v16 = vpop.f32.mrf.mxu0 }
  0x96   :  { %v120_v18 = vadd.f32 %v437_v17, %v119_v16 }
  0x98   :  { %v124_v21 = vmax.f32 %v120_v18, 0.0 }
  0x9d   :  { %v121_v19 = vpop.f32.mrf.mxu0 }
  0x9e   :  { %v122_v20 = vadd.f32 %v437_v17, %v121_v19 }
  0xa0   :  { %v125_v22 = vmax.f32 %v122_v20, 0.0 }
  0xa2   :  { %v126_v23 = vpack.c.bf16 %v125_v22, %v124_v21 }
  0xa4   :  { %203 = vmatmul.bf16.vlgmr.msra.gmra.mxu1 %v126_v23 }
 0x121   :  { %v204_v28 = vpop.f32.mrf.mxu1 }
 0x122   :  { %v205_v30 = vadd.f32 %v438_v29, %v204_v28 }
 0x124   :  { %v209_v33 = vmax.f32 %v205_v30, 0.0 }
 0x129   :  { %v206_v31 = vpop.f32.mrf.mxu1 }
 0x12a   :  { %v207_v32 = vadd.f32 %v438_v29, %v206_v31 }
 0x12c   :  { %v210_v34 = vmax.f32 %v207_v32, 0.0 }
 0x12e   :  { %v211_v35 = vpack.c.bf16 %v210_v34, %v209_v33 }
 0x130   :  { %288 = vmatmul.bf16.vlgmr.msra.gmra.mxu2 %v211_v35 }
 0x1b3   :  { %v289_v37 = vpop.f32.mrf.mxu2 }
 0x1b4   :  { %v290_v38 = vadd.f32 %v439_v36, %v289_v37 }
 0x1b6   :  { %294 = vmax.xlane.f32.xlu0 %v290_v38 }
 0x1bb   :  { %v291_v39 = vpop.f32.mrf.mxu2 }
 0x1bc   :  { %v292_v40 = vadd.f32 %v439_v36, %v291_v39 }
 0x1be   :  { %296 = vmax.xlane.f32.xlu0 %v292_v40 }
 0x229   :  { %v295_v41 = vpop.xlane.xlu0 %294 }
 0x22a   :  { %v298_v42 = vsub.f32 %v290_v38, %v295_v41 }
 0x22c   :  { %v300_v43 = vmul.f32 1.442695, %v298_v42 }
 0x22e   :  { %440 = vpow2.f32 %v300_v43 }
 0x231   :  { %v297_v44 = vpop.xlane.xlu0 %296 }
 0x232   :  { %v299_v45 = vsub.f32 %v292_v40, %v297_v44 }
 0x234   :  { %v441_v46 = vpop.eup %440  ;;  %v302_v47 = vmul.f32 1.442695, %v299_v45 }
 0x235   :  { %304 = vadd.xlane.f32.xlu1 %v441_v46 }
 0x236   :  { %442 = vpow2.f32 %v302_v47 }
 0x23c   :  { %v443_v48 = vpop.eup %442 }
 0x23d   :  { %306 = vadd.xlane.f32.xlu1 %v443_v48 }
 0x2a8   :  { %v305_v49 = vpop.xlane.xlu1 %304 }
 0x2a9   :  { %444 = vrcp.f32 %v305_v49 }
 0x2af   :  { %v445_v51 = vpop.eup %444 }
 0x2b0   :  { %v307_v50 = vpop.xlane.xlu1 %306  ;;  %v310_v54 = vmul.f32 %v445_v51, %v441_v46 }
 0x2b1   :  { %446 = vrcp.f32 %v307_v50 }
 0x2b7   :  { %v447_v52 = vpop.eup %446 }
 0x2b8   :  { %v311_v53 = vmul.f32 %v447_v52, %v443_v48 }
 0x2ba   :  { %v426_v55 = vpack.c.bf16 %v311_v53, %v310_v54 }
 0x2bc   :  { %427 = vst [vmem:[#allocation10] sm:$0xff] %v426_v55  }
 0x2bd   :  { %328 = dma.vmem_to_hbm [thread:$0]  %s321_s6, 128, %s323_s28, [#allocation4], %s577_s9, %s577_s9, %s578_s10  }
 0x2be   :  { %574 = dma.done.wait [#allocation4], 128  }
 0x2bf   :  { %575 = vsyncadd [#allocation4], 4294967168 }
 0x2c0   :  { %333 = vsyncpa [#allocation3], 1 }
 0x2c1   :  { %334 = vsyncpa [#allocation6], 1 }
 0x2c2   :  { %335 = vsyncpa [#allocation9], 1 }
 0x2c3   :  { %336 = vsyncpa [#allocation4], 1 }

</bundles_post_ra>
